<compile_context>
chip_gen: v7x
topology: tpu7x:2x2x1
jax: 0.10.0
libtpu: 0.0.40
codegen_flags: <defaults>
</compile_context>

<pallas_src>
import math
import functools

import jax
import jax.numpy as jnp
from jax.experimental import pallas as pl
from jax.experimental.pallas import tpu as pltpu

# Constants matching the PyTorch module (first forward call: iter = 1).
M = 4                       # margin
BASE = 1000.0
GAMMA = 0.12
POWER = 1
LAMBDA_MIN = 5.0
PI_CONST = 3.14159265       # the literal used in the PyTorch code (not math.pi)


def _round_up(x, mult):
    return ((x + mult - 1) // mult) * mult


def _chebyshev(x, m):
    """cos(m*theta) as a polynomial in cos(theta) (PyTorch `mlambda[m]`)."""
    if m == 0:
        return jnp.ones_like(x)
    if m == 1:
        return x
    if m == 2:
        return 2.0 * x * x - 1.0
    if m == 3:
        return (4.0 * x * x - 3.0) * x
    if m == 4:
        c2 = x * x
        return 8.0 * c2 * c2 - 8.0 * c2 + 1.0
    if m == 5:
        c2 = x * x
        return ((16.0 * c2 - 20.0) * c2 + 5.0) * x
    raise ValueError(f"unsupported margin m={m}")


def _sphereface_kernel(lamb_ref, xn_ref, xnorm_ref, wn_ref, label_ref, out_ref,
                       *, m, tc):
    j = pl.program_id(0)                         # class-tile index (outer axis)

    # --- cos_theta = x_n @ w_n, clamped to [-1, 1] ---  (MXU, f32 accumulate)
    x_n = xn_ref[...]                            # (TB, D_pad), pre-normalized
    w_n = wn_ref[...]                            # (D_pad, TC), pre-normalized, VMEM-resident
    cos_theta = jnp.dot(x_n, w_n, preferred_element_type=jnp.float32)
    cos_theta = jnp.clip(cos_theta, -1.0, 1.0)   # (TB, TC)

    # --- one_hot.scatter_(1, label, 1): iota offset by this tile's column 0 ---
    lab = label_ref[...]                         # (TB, 1) int32
    col = jax.lax.broadcasted_iota(jnp.int32, cos_theta.shape, 1) + j * tc
    hit = col == lab                             # (TB, TC) bool
    one_hot = hit.astype(jnp.float32)

    # --- gather cos_theta at the label column (0 if label not in this tile) ---
    cos_lab = jnp.sum(jnp.where(hit, cos_theta, 0.0), axis=1, keepdims=True)  # (TB,1)

    # --- margin math only on the (TB, 1) label values ---
    cos_m_lab = _chebyshev(cos_lab, m)
    # k = floor(m * acos(c) / pi):  acos is monotone decreasing, so
    # m*acos(c)/pi >= jj  <=>  c <= cos(jj*pi/m)  -> pure compares, no acos.
    k = jnp.zeros_like(cos_lab)
    for jj in range(1, m + 1):
        thr = math.cos(jj * PI_CONST / m)
        k = k + (cos_lab <= thr).astype(jnp.float32)
    sign = 1.0 - 2.0 * jnp.mod(k, 2.0)           # (-1)^k
    phi_lab = sign * cos_m_lab - 2.0 * k         # (TB, 1)

    # --- output = (cos_theta + one_hot * (phi - cos)/(1+lamb)) * ||x|| ---
    inv_one_plus_lamb = lamb_ref[0]              # SMEM scalar (no recompiles)
    delta = (phi_lab - cos_lab) * inv_one_plus_lamb          # (TB, 1)
    x_norm = xnorm_ref[...]                                  # (TB, 1)
    out_ref[...] = ((cos_theta + one_hot * delta) * x_norm).astype(out_ref.dtype)


def sphereface_forward(x, weight, label, *, m=M, iteration=1,
                       tc=1024, tb=256, mxu_dtype=jnp.bfloat16,
                       out_dtype=jnp.float32):
    """x: (B, in_features) f32; weight: (out_features, in_features) f32;
    label: (B,) int. Returns (B, out_features) out_dtype."""
    B, D = x.shape
    C, D2 = weight.shape
    assert D == D2

    lamb = max(LAMBDA_MIN, BASE * (1.0 + GAMMA * iteration) ** (-POWER))
    inv_one_plus_lamb = jnp.full((1,), 1.0 / (1.0 + lamb), dtype=jnp.float32)

    # --- hoisted: F.normalize(input, dim=1) and torch.norm(input, 2, 1) ---
    xf = x.astype(jnp.float32)
    x_norm = jnp.linalg.norm(xf, axis=1, keepdims=True)          # (B, 1)
    x_n = (xf / jnp.maximum(x_norm, 1e-12)).astype(mxu_dtype)    # (B, D)

    # --- hoisted: F.normalize(weight, dim=1), transpose, MXU-dtype cast ---
    w_n = weight / jnp.maximum(
        jnp.linalg.norm(weight, axis=1, keepdims=True), 1e-12)
    wt = w_n.T.astype(mxu_dtype)                                 # (D, C)

    # Tile-aligned padding: D to 128 (MXU K / lane dim), C to TC, B to TB.
    D_pad = _round_up(D, 128)
    TC = min(tc, _round_up(C, 128))
    C_pad = _round_up(C, TC)
    TB = min(tb, _round_up(B, 8))
    B_pad = _round_up(B, TB)

    if D_pad != D:
        x_n = jnp.pad(x_n, ((0, 0), (0, D_pad - D)))
        wt = jnp.pad(wt, ((0, D_pad - D), (0, 0)))
    if C_pad != C:
        wt = jnp.pad(wt, ((0, 0), (0, C_pad - C)))
    if B_pad != B:
        x_n = jnp.pad(x_n, ((0, B_pad - B), (0, 0)))
        x_norm = jnp.pad(x_norm, ((0, B_pad - B), (0, 0)))
        label = jnp.pad(label, (0, B_pad - B))

    label2 = label.reshape(B_pad, 1).astype(jnp.int32)

    # Class tiles on the OUTER axis -> each (D_pad, TC) weight block is DMA'd
    # once and reused across all inner batch tiles.
    grid = (C_pad // TC, B_pad // TB)
    n_ct = grid[0]

    kernel = functools.partial(_sphereface_kernel, m=m, tc=TC)

    w_itemsize = jnp.dtype(mxu_dtype).itemsize
    cost = pl.CostEstimate(
        flops=2 * B_pad * D_pad * C_pad,
        transcendentals=0,
        bytes_accessed=(D_pad * C_pad * w_itemsize            # weight: streamed once
                        + B_pad * D_pad * w_itemsize * n_ct   # x_n: once per class tile
                        + B_pad * 4 * n_ct                    # x_norm
                        + B_pad * 4 * n_ct                    # labels
                        + B_pad * C_pad * jnp.dtype(out_dtype).itemsize))

    out = pl.pallas_call(
        kernel,
        out_shape=jax.ShapeDtypeStruct((B_pad, C_pad), out_dtype),
        grid=grid,
        in_specs=[
            pl.BlockSpec(memory_space=pltpu.MemorySpace.SMEM),       # 1/(1+lamb)
            pl.BlockSpec((TB, D_pad), lambda j, i: (i, 0)),          # x_n: per batch tile
            pl.BlockSpec((TB, 1), lambda j, i: (i, 0)),              # ||x||
            pl.BlockSpec((D_pad, TC), lambda j, i: (0, j)),          # weight: resident per class tile
            pl.BlockSpec((TB, 1), lambda j, i: (i, 0)),              # label
        ],
        out_specs=pl.BlockSpec((TB, TC), lambda j, i: (i, j)),
        compiler_params=pltpu.CompilerParams(
            # Outer class axis "parallel" -> megacore shards the weight stream
            # (each TC streams only its half of the classes exactly once).
            dimension_semantics=("parallel", "arbitrary")),
        cost_estimate=cost,
    )(inv_one_plus_lamb, x_n, x_norm, wt, label2)

    return out[:B, :C]


def sphereface_reference(x, weight, label, *, m=M, iteration=1):
    """Pure-JAX reference mirroring the PyTorch forward (device_id=None path)."""
    lamb = max(LAMBDA_MIN, BASE * (1.0 + GAMMA * iteration) ** (-POWER))
    x_norm = jnp.linalg.norm(x, axis=1, keepdims=True)
    x_n = x / jnp.maximum(x_norm, 1e-12)
    w_n = weight / jnp.maximum(
        jnp.linalg.norm(weight, axis=1, keepdims=True), 1e-12)
    cos_theta = jnp.clip(x_n @ w_n.T, -1.0, 1.0)
    cos_m_theta = _chebyshev(cos_theta, m)
    theta = jnp.arccos(cos_theta)
    k = jnp.floor(m * theta / PI_CONST)
    phi_theta = (-1.0) ** k * cos_m_theta - 2.0 * k
    one_hot = jax.nn.one_hot(label, weight.shape[0], dtype=jnp.float32)
    out = one_hot * (phi_theta - cos_theta) / (1.0 + lamb) + cos_theta
    return out * x_norm


if __name__ == "__main__":
    in_features = 32        # pads to D_pad = 128
    out_features = 300      # pads to C_pad = 384 (one class tile at default tc)
    batch = 10              # pads to 16 rows

    key = jax.random.PRNGKey(0)
    kx, kw, kl = jax.random.split(key, 3)

    x = jax.random.normal(kx, (batch, in_features), dtype=jnp.float32)

    # Deterministic Xavier-uniform init for weight (out_features, in_features).
    bound = math.sqrt(6.0 / (in_features + out_features))
    weight = jax.random.uniform(
        kw, (out_features, in_features), dtype=jnp.float32,
        minval=-bound, maxval=bound)

    label = jax.random.randint(kl, (batch,), 0, out_features, dtype=jnp.int32)

    ref = sphereface_reference(x, weight, label)

    # f32 MXU path: tight comparison against the reference.
    out_f32 = sphereface_forward(x, weight, label, mxu_dtype=jnp.float32)
    out_f32 = jax.block_until_ready(out_f32)
    assert out_f32.shape == (batch, out_features)
    assert jnp.allclose(out_f32, ref, atol=1e-4, rtol=1e-4), (
        f"f32 path max abs err = {jnp.max(jnp.abs(out_f32 - ref))}")

    # Default bf16 MXU path (native MXU dtype on v6e/v7x, half the HBM traffic
    # for x and weight); f32 accumulation keeps the error modest.
    out_bf16 = sphereface_forward(x, weight, label)
    out_bf16 = jax.block_until_ready(out_bf16)
    assert out_bf16.shape == (batch, out_features)
    assert jnp.allclose(out_bf16, ref, atol=1e-1, rtol=5e-2), (
        f"bf16 path max abs err = {jnp.max(jnp.abs(out_bf16 - ref))}")

    print("KERNEL_OK")
</pallas_src>

<mosaic_0001>
module attributes {stable_mosaic.version = 11 : i64} {
  func.func @_sphereface_kernel(%arg0: i32, %arg1: i32, %arg2: memref<1xf32, #tpu.memory_space<smem>>, %arg3: memref<16x128xf32, #tpu.memory_space<vmem>>, %arg4: memref<16x1xf32, #tpu.memory_space<vmem>>, %arg5: memref<128x384xf32, #tpu.memory_space<vmem>>, %arg6: memref<16x1xi32, #tpu.memory_space<vmem>>, %arg7: memref<16x384xf32, #tpu.memory_space<vmem>>) attributes {dimension_semantics = [#tpu.dimension_semantics<parallel>, #tpu.dimension_semantics<arbitrary>], iteration_bounds = array<i64: 1, 1>, scalar_prefetch = 0 : i64, scratch_operands = 0 : i64, tpu.core_type = #tpu.core_type<tc>, window_params = [{transform_indices = @transform_0, window_bounds = array<i64: 1>}, {transform_indices = @transform_1, window_bounds = array<i64: 16, 128>}, {transform_indices = @transform_2, window_bounds = array<i64: 16, 1>}, {transform_indices = @transform_3, window_bounds = array<i64: 128, 384>}, {transform_indices = @transform_4, window_bounds = array<i64: 16, 1>}, {transform_indices = @transform_5, window_bounds = array<i64: 16, 384>}]} {
    %c0 = arith.constant 0 : index
    %c0_0 = arith.constant 0 : index
    %0 = vector.load %arg3[%c0, %c0_0] : memref<16x128xf32, #tpu.memory_space<vmem>>, vector<16x128xf32>
    %c0_1 = arith.constant 0 : index
    %c0_2 = arith.constant 0 : index
    %1 = vector.load %arg5[%c0_1, %c0_2] : memref<128x384xf32, #tpu.memory_space<vmem>>, vector<128x384xf32>
    %cst = arith.constant dense<0.000000e+00> : vector<16x384xf32>
    %2 = tpu.matmul %0, %1, %cst {dimension_numbers = #tpu.dot_dimension_numbers<[1], [0], [0], [1], [0, 0, 1, 1], [], []>} : vector<16x128xf32>, vector<128x384xf32>, vector<16x384xf32> -> vector<16x384xf32>
    %cst_3 = arith.constant -1.000000e+00 : f32
    %cst_4 = arith.constant 1.000000e+00 : f32
    %3 = vector.broadcast %cst_3 : f32 to vector<16x384xf32>
    %4 = arith.maximumf %3, %2 : vector<16x384xf32>
    %5 = vector.broadcast %cst_4 : f32 to vector<16x384xf32>
    %6 = arith.minimumf %5, %4 : vector<16x384xf32>
    %c0_5 = arith.constant 0 : index
    %c0_6 = arith.constant 0 : index
    %7 = vector.load %arg6[%c0_5, %c0_6] : memref<16x1xi32, #tpu.memory_space<vmem>>, vector<16x1xi32>
    %8 = tpu.iota {dimensions = array<i32: 1>} : vector<16x384xi32>
    %c384_i32 = arith.constant 384 : i32
    %9 = arith.muli %arg0, %c384_i32 : i32
    %10 = vector.broadcast %9 : i32 to vector<16x384xi32>
    %11 = arith.addi %8, %10 : vector<16x384xi32>
    %12 = vector.broadcast %7 : vector<16x1xi32> to vector<16x384xi32>
    %13 = arith.cmpi eq, %11, %12 : vector<16x384xi32>
    %14 = arith.extui %13 : vector<16x384xi1> to vector<16x384xi32>
    %15 = arith.sitofp %14 : vector<16x384xi32> to vector<16x384xf32>
    %cst_7 = arith.constant 0.000000e+00 : f32
    %16 = vector.broadcast %cst_7 : f32 to vector<16x384xf32>
    %17 = arith.select %13, %6, %16 : vector<16x384xi1>, vector<16x384xf32>
    %cst_8 = arith.constant dense<0.000000e+00> : vector<16xf32>
    %18 = vector.multi_reduction <add>, %17, %cst_8 [1] : vector<16x384xf32> to vector<16xf32>
    %19 = vector.shape_cast %18 : vector<16xf32> to vector<16x1xf32>
    %20 = arith.mulf %19, %19 : vector<16x1xf32>
    %cst_9 = arith.constant 8.000000e+00 : f32
    %21 = vector.broadcast %cst_9 : f32 to vector<16x1xf32>
    %22 = arith.mulf %21, %20 : vector<16x1xf32>
    %23 = arith.mulf %22, %20 : vector<16x1xf32>
    %cst_10 = arith.constant 8.000000e+00 : f32
    %24 = vector.broadcast %cst_10 : f32 to vector<16x1xf32>
    %25 = arith.mulf %24, %20 : vector<16x1xf32>
    %26 = arith.subf %23, %25 : vector<16x1xf32>
    %cst_11 = arith.constant 1.000000e+00 : f32
    %27 = vector.broadcast %cst_11 : f32 to vector<16x1xf32>
    %28 = arith.addf %26, %27 : vector<16x1xf32>
    %cst_12 = arith.constant 0.000000e+00 : f32
    %29 = vector.broadcast %cst_12 : f32 to vector<16x1xf32>
    %cst_13 = arith.constant 0.707106769 : f32
    %30 = vector.broadcast %cst_13 : f32 to vector<16x1xf32>
    %31 = arith.cmpf ole, %19, %30 : vector<16x1xf32>
    %32 = arith.extui %31 : vector<16x1xi1> to vector<16x1xi32>
    %33 = arith.sitofp %32 : vector<16x1xi32> to vector<16x1xf32>
    %34 = arith.addf %29, %33 : vector<16x1xf32>
    %cst_14 = arith.constant 1.79489656E-9 : f32
    %35 = vector.broadcast %cst_14 : f32 to vector<16x1xf32>
    %36 = arith.cmpf ole, %19, %35 : vector<16x1xf32>
    %37 = arith.extui %36 : vector<16x1xi1> to vector<16x1xi32>
    %38 = arith.sitofp %37 : vector<16x1xi32> to vector<16x1xf32>
    %39 = arith.addf %34, %38 : vector<16x1xf32>
    %cst_15 = arith.constant -0.707106769 : f32
    %40 = vector.broadcast %cst_15 : f32 to vector<16x1xf32>
    %41 = arith.cmpf ole, %19, %40 : vector<16x1xf32>
    %42 = arith.extui %41 : vector<16x1xi1> to vector<16x1xi32>
    %43 = arith.sitofp %42 : vector<16x1xi32> to vector<16x1xf32>
    %44 = arith.addf %39, %43 : vector<16x1xf32>
    %cst_16 = arith.constant -1.000000e+00 : f32
    %45 = vector.broadcast %cst_16 : f32 to vector<16x1xf32>
    %46 = arith.cmpf ole, %19, %45 : vector<16x1xf32>
    %47 = arith.extui %46 : vector<16x1xi1> to vector<16x1xi32>
    %48 = arith.sitofp %47 : vector<16x1xi32> to vector<16x1xf32>
    %49 = arith.addf %44, %48 : vector<16x1xf32>
    %cst_17 = arith.constant 2.000000e+00 : f32
    %50 = vector.broadcast %cst_17 : f32 to vector<16x1xf32>
    %51 = arith.remf %49, %50 : vector<16x1xf32>
    %cst_18 = arith.constant 0.000000e+00 : f32
    %52 = vector.broadcast %cst_18 : f32 to vector<16x1xf32>
    %53 = arith.cmpf one, %51, %52 : vector<16x1xf32>
    %cst_19 = arith.constant 0.000000e+00 : f32
    %54 = vector.broadcast %cst_19 : f32 to vector<16x1xf32>
    %55 = arith.cmpf olt, %51, %54 : vector<16x1xf32>
    %cst_20 = arith.constant 0.000000e+00 : f32
    %56 = arith.cmpf olt, %cst_17, %cst_20 : f32
    %57 = vector.broadcast %56 : i1 to vector<16x1xi1>
    %58 = vector.broadcast %57 : vector<16x1xi1> to vector<16x1xi1>
    %59 = arith.xori %55, %58 : vector<16x1xi1>
    %60 = arith.andi %59, %53 : vector<16x1xi1>
    %61 = vector.broadcast %cst_17 : f32 to vector<16x1xf32>
    %62 = arith.addf %51, %61 : vector<16x1xf32>
    %63 = arith.select %60, %62, %51 : vector<16x1xi1>, vector<16x1xf32>
    %cst_21 = arith.constant 2.000000e+00 : f32
    %64 = vector.broadcast %cst_21 : f32 to vector<16x1xf32>
    %65 = arith.mulf %64, %63 : vector<16x1xf32>
    %cst_22 = arith.constant 1.000000e+00 : f32
    %66 = vector.broadcast %cst_22 : f32 to vector<16x1xf32>
    %67 = arith.subf %66, %65 : vector<16x1xf32>
    %68 = arith.mulf %67, %28 : vector<16x1xf32>
    %cst_23 = arith.constant 2.000000e+00 : f32
    %69 = vector.broadcast %cst_23 : f32 to vector<16x1xf32>
    %70 = arith.mulf %69, %49 : vector<16x1xf32>
    %71 = arith.subf %68, %70 : vector<16x1xf32>
    %c0_24 = arith.constant 0 : index
    %72 = memref.load %arg2[%c0_24] : memref<1xf32, #tpu.memory_space<smem>>
    %73 = arith.subf %71, %19 : vector<16x1xf32>
    %74 = vector.broadcast %72 : f32 to vector<16x1xf32>
    %75 = arith.mulf %73, %74 : vector<16x1xf32>
    %c0_25 = arith.constant 0 : index
    %c0_26 = arith.constant 0 : index
    %76 = vector.load %arg4[%c0_25, %c0_26] : memref<16x1xf32, #tpu.memory_space<vmem>>, vector<16x1xf32>
    %77 = vector.broadcast %75 : vector<16x1xf32> to vector<16x384xf32>
    %78 = arith.mulf %15, %77 : vector<16x384xf32>
    %79 = arith.addf %6, %78 : vector<16x384xf32>
    %80 = vector.broadcast %76 : vector<16x1xf32> to vector<16x384xf32>
    %81 = arith.mulf %79, %80 : vector<16x384xf32>
    %c0_27 = arith.constant 0 : index
    %c0_28 = arith.constant 0 : index
    %82 = vector.load %arg7[%c0_27, %c0_28] : memref<16x384xf32, #tpu.memory_space<vmem>>, vector<16x384xf32>
    tpu.vector_store %arg7[%c0_27, %c0_28], %81 {strides = array<i32>} : memref<16x384xf32, #tpu.memory_space<vmem>>, vector<16x384xf32>,
    return
  }
  func.func @transform_0(%arg0: i32, %arg1: i32) -> i32 {
    %c0_i32 = arith.constant 0 : i32
    %c0_i32_0 = arith.constant 0 : i32
    return %c0_i32 : i32
  }
  func.func @transform_1(%arg0: i32, %arg1: i32) -> (i32, i32) {
    %c0_i32 = arith.constant 0 : i32
    %c0_i32_0 = arith.constant 0 : i32
    return %arg1, %c0_i32 : i32, i32
  }
  func.func @transform_2(%arg0: i32, %arg1: i32) -> (i32, i32) {
    %c0_i32 = arith.constant 0 : i32
    %c0_i32_0 = arith.constant 0 : i32
    return %arg1, %c0_i32 : i32, i32
  }
  func.func @transform_3(%arg0: i32, %arg1: i32) -> (i32, i32) {
    %c0_i32 = arith.constant 0 : i32
    %c0_i32_0 = arith.constant 0 : i32
    return %c0_i32, %arg0 : i32, i32
  }
  func.func @transform_4(%arg0: i32, %arg1: i32) -> (i32, i32) {
    %c0_i32 = arith.constant 0 : i32
    %c0_i32_0 = arith.constant 0 : i32
    return %arg1, %c0_i32 : i32, i32
  }
  func.func @transform_5(%arg0: i32, %arg1: i32) -> (i32, i32) {
    %c0_i32 = arith.constant 0 : i32
    return %arg1, %arg0 : i32, i32
  }
}

</mosaic_0001>

<bundles_post_ra>
// kernel: tpu_custom_call.1
= control target key start
LH: loop header
LB: loop body
LE: loop exit
PB: predicated region body
PF: predicated region fallthrough
CT: control target
= control target key end

     0   :  { %11 = vsyncpa [#allocation4], 0  ;;  %s858_s0 = inlined_call_operand.<no memory space> [shape: f32[1], index: 0, kind: input, shape index: {}]   ;;  %s859_s1 = inlined_call_operand.vmem [shape: f32[16,128], index: 1, kind: input, shape index: {}]   ;;  %s860_s2 = inlined_call_operand.vmem [shape: f32[16,1], index: 2, kind: input, shape index: {}]   ;;  %s861_s3 = inlined_call_operand.hbm [shape: f32[128,384], index: 3, kind: input, shape index: {}]   ;;  %s862_s4 = inlined_call_operand.vmem [shape: s32[16,1], index: 4, kind: input, shape index: {}]   ;;  %s863_s5 = inlined_call_operand.hbm [shape: f32[16,384], index: 5, kind: output, shape index: {}]  }
   0x1   :  { %12 = vsyncpa [#allocation5], 0  ;;  %s635_s18 = smov [#allocation3]   ;;  %s587_s22 = scalar_lea.hbm %s861_s3, 6144 }
   0x2   :  { %s24_s19 = sshll.u32 %s635_s18, 4  ;;  %p588_p0 = scmp.ne.s32.totalorder %s861_s3, %s587_s22  ;;  %s25_s19 = int_to_ptr.vmem [resolvable:$true] %s24_s19 }
   0x3   :  { %p591_p1 = scmp.lt.u32.totalorder %s587_s22, %s861_s3 }
   0x5   :  { %p593_p2 = pnand %p591_p1, %p588_p0 }
   0x7   :  { %596 = shalt.err (!%p593_p2)
}
   0x8   :  { %s597_s27 = scalar_lea.vmem %s25_s19, 6144  ;;  %p602_p4 = scmp.lt.s32.totalorder %s25_s19, %s25_s19 }
   0x9   :  { %p598_p3 = scmp.ne.s32.totalorder %s25_s19, %s597_s27  ;;  %p603_p5 = scmp.lt.s32.totalorder %s597_s27, %s597_s27 }
   0xb   :  { %p604_p6 = por %p603_p5, %p602_p4 }
   0xd   :  { %p605_p7 = pnand %p604_p6, %p598_p3 }
   0xf   :  { %608 = shalt.err (!%p605_p7)
}
  0x10   :  { %s636_s28 = smov 384   ;;  %s637_s29 = smov 24  }
  0x11   :  { %30 = dma.hbm_to_vmem [thread:$0]  %s861_s3, 6144, %s25_s19, [#allocation4], %s636_s28, %s636_s28, %s637_s29  }
  0x12   :  { %631 = dma.done.wait [#allocation4], 6144  }
  0x13   :  { %632 = vsyncadd [#allocation4], 4294961152  ;;  %v638_v0 = vmov 0.0   ;;  %v639_v1 = vmov 0   ;;  %v39_v2 = vld [vmem:[#allocation3 + $0x8] sm:$0xff]  ;;  %v42_v3 = vld [vmem:[#allocation3 + $0x20] sm:$0xff] }
  0x14   :  { %150 = vmatprep.mubr.f32.mxu0 %v638_v0  ;;  %585 = vset.pattern.permute.xlu0 %v639_v1  ;;  %v40_v4 = vld [vmem:[#allocation3 + $0x10] sm:$0xff]  ;;  %v515_v5 = vpack.c.bf16 %v42_v3, %v39_v2  ;;  %v43_v6 = vld [vmem:[#allocation3 + $0x28] sm:$0xff]  ;;  %v38_v7 = vld [vmem:[#allocation3] sm:$0xff] }
  0x15   :  { %586 = vset.pattern.permute.xlu1 %v639_v1  ;;  %v41_v8 = vld [vmem:[#allocation3 + $0x18] sm:$0xff]  ;;  %v547_v9 = vpack.c.bf16 %v43_v6, %v40_v4  ;;  %v48_v12 = vld [vmem:[#allocation3 + $0x50] sm:$0xff]  ;;  %v46_v13 = vld [vmem:[#allocation3 + $0x40] sm:$0xff] }
  0x16   :  { %v517_v10 = vpack.c.bf16 %v41_v8, %v38_v7  ;;  %v45_v11 = vld [vmem:[#allocation3 + $0x38] sm:$0xff]  ;;  %516 = vmatprep.subr.bf16.mxu0 %v515_v5  ;;  %v44_v16 = vld [vmem:[#allocation3 + $0x30] sm:$0xff]  ;;  %v47_v17 = vld [vmem:[#allocation3 + $0x48] sm:$0xff] }
  0x17   :  { %v519_v14 = vpack.c.bf16 %v48_v12, %v45_v11  ;;  %v49_v15 = vld [vmem:[#allocation3 + $0x58] sm:$0xff]  ;;  %548 = vmatprep.subr.bf16.mxu1 %v547_v9  ;;  %v521_v19 = vpack.c.bf16 %v47_v17, %v44_v16  ;;  %v51_v20 = vld [vmem:[#allocation3 + $0x68] sm:$0xff]  ;;  %v54_v21 = vld [vmem:[#allocation3 + $0x80] sm:$0xff]  ;;  %v252_v16 = vlaneseq }
  0x18   :  { %518 = vmatpush1.bf16.msra.mxu0 %v517_v10  ;;  %v551_v18 = vpack.c.bf16 %v49_v15, %v46_v13  ;;  %v52_v22 = vld [vmem:[#allocation3 + $0x70] sm:$0xff]  ;;  %550 = vmatpush3.bf16.msra.mxu1 %v547_v9  ;;  %v523_v23 = vpack.c.bf16 %v54_v21, %v51_v20  ;;  %v55_v24 = vld [vmem:[#allocation3 + $0x88] sm:$0xff]  ;;  %v50_v25 = vld [vmem:[#allocation3 + $0x60] sm:$0xff] }
  0x19   :  { %520 = vmatprep.subr.bf16.mxu0 %v519_v14  ;;  %v53_v26 = vld [vmem:[#allocation3 + $0x78] sm:$0xff]  ;;  %v555_v27 = vpack.c.bf16 %v55_v24, %v52_v22  ;;  %v60_v29 = vld [vmem:[#allocation3 + $0xb0] sm:$0xff]  ;;  %v58_v30 = vld [vmem:[#allocation3 + $0xa0] sm:$0xff]  ;;  %v703_v17 = vand.u32 127, %v252_v16 }
  0x1a   :  { %552 = vmatprep.subr.bf16.mxu1 %v551_v18  ;;  %v57_v28 = vld [vmem:[#allocation3 + $0x98] sm:$0xff]  ;;  %v525_v32 = vpack.c.bf16 %v53_v26, %v50_v25  ;;  %v56_v34 = vld [vmem:[#allocation3 + $0x90] sm:$0xff]  ;;  %v59_v35 = vld [vmem:[#allocation3 + $0xa8] sm:$0xff] }
  0x1b   :  { %v61_v31 = vld [vmem:[#allocation3 + $0xb8] sm:$0xff]  ;;  %v527_v33 = vpack.c.bf16 %v60_v29, %v57_v28  ;;  %v63_v37 = vld [vmem:[#allocation3 + $0xc8] sm:$0xff]  ;;  %v66_v38 = vld [vmem:[#allocation3 + $0xe0] sm:$0xff]  ;;  %v529_v41 = vpack.c.bf16 %v59_v35, %v56_v34  ;;  %v711_v20 = vadd.s32 256, %v703_v17 }
  0x1c   :  { %522 = vmatpush1.bf16.msra.mxu0 %v521_v19  ;;  %554 = vmatpush3.bf16.msra.mxu1 %v551_v18  ;;  %v559_v36 = vpack.c.bf16 %v61_v31, %v58_v30  ;;  %v64_v39 = vld [vmem:[#allocation3 + $0xd0] sm:$0xff]  ;;  %v67_v40 = vld [vmem:[#allocation3 + $0xe8] sm:$0xff]  ;;  %v531_v42 = vpack.c.bf16 %v66_v38, %v63_v37  ;;  %v62_v43 = vld [vmem:[#allocation3 + $0xc0] sm:$0xff]  ;;  %v706_v18 = vadd.s32 128, %v703_v17 }
  0x1d   :  { %524 = vmatprep.subr.bf16.mxu0 %v523_v23  ;;  %556 = vmatprep.subr.bf16.mxu1 %v555_v27  ;;  %v65_v44 = vld [vmem:[#allocation3 + $0xd8] sm:$0xff]  ;;  %v563_v45 = vpack.c.bf16 %v67_v40, %v64_v39  ;;  %v72_v47 = vld [vmem:[#allocation3 + $0x110] sm:$0xff]  ;;  %v70_v48 = vld [vmem:[#allocation3 + $0x100] sm:$0xff] }
  0x1e   :  { %v69_v46 = vld [vmem:[#allocation3 + $0xf8] sm:$0xff]  ;;  %v533_v50 = vpack.c.bf16 %v65_v44, %v62_v43  ;;  %v36_v51 = vld [vmem:[%s859_s1] sm:$0xff]  ;;  %v68_v54 = vld [vmem:[#allocation3 + $0xf0] sm:$0xff] }
  0x1f   :  { %v73_v49 = vld [vmem:[#allocation3 + $0x118] sm:$0xff]  ;;  %v250_v52 = vld [vmem:[%s862_s4] sm:$0xff]  ;;  %v535_v53 = vpack.c.bf16 %v72_v47, %v69_v46  ;;  %v71_v55 = vld [vmem:[#allocation3 + $0x108] sm:$0xff]  ;;  %512 = vmatprep.mubr.f32.mxu1 %v36_v51 }
  0x20   :  { %526 = vmatpush1.bf16.msra.mxu0 %v525_v32  ;;  %558 = vmatpush3.bf16.msra.mxu1 %v555_v27  ;;  %v567_v56 = vpack.c.bf16 %v73_v49, %v70_v48  ;;  %v75_v57 = vld [vmem:[#allocation3 + $0x128] sm:$0xff]  ;;  %v78_v58 = vld [vmem:[#allocation3 + $0x140] sm:$0xff]  ;;  %v76_v59 = vld [vmem:[#allocation3 + $0x130] sm:$0xff]  ;;  %v537_v61 = vpack.c.bf16 %v71_v55, %v68_v54 }
  0x21   :  { %528 = vmatprep.subr.bf16.mxu0 %v527_v33  ;;  %560 = vmatprep.subr.bf16.mxu1 %v559_v36  ;;  %v79_v60 = vld [vmem:[#allocation3 + $0x148] sm:$0xff]  ;;  %v539_v63 = vpack.c.bf16 %v78_v58, %v75_v57  ;;  %v74_v1 = vld [vmem:[#allocation3 + $0x120] sm:$0xff]  ;;  %v77_v2 = vld [vmem:[#allocation3 + $0x138] sm:$0xff] }
  0x22   :  { %262 = vperm.xlu0 %585, %v250_v52   ;;  %v251_v62 = vld [vmem:[%s862_s4 + $0x8] sm:$0xff]  ;;  %v571_v3 = vpack.c.bf16 %v79_v60, %v76_v59  ;;  %v81_v4 = vld [vmem:[#allocation3 + $0x158] sm:$0xff]  ;;  %v84_v5 = vld [vmem:[#allocation3 + $0x170] sm:$0xff]  ;;  %v541_v8 = vpack.c.bf16 %v77_v2, %v74_v1 }
  0x23   :  { %v82_v6 = vld [vmem:[#allocation3 + $0x160] sm:$0xff]  ;;  %v85_v7 = vld [vmem:[#allocation3 + $0x178] sm:$0xff]  ;;  %v543_v10 = vpack.c.bf16 %v84_v5, %v81_v4  ;;  %v80_v11 = vld [vmem:[#allocation3 + $0x150] sm:$0xff] }
  0x24   :  { %530 = vmatpush1.bf16.msra.mxu0 %v529_v41  ;;  %562 = vmatpush3.bf16.msra.mxu1 %v559_v36  ;;  %v389_v9 = vld [vmem:[%s860_s2] sm:$0xff]  ;;  %v83_v12 = vld [vmem:[#allocation3 + $0x168] sm:$0xff]  ;;  %v575_v13 = vpack.c.bf16 %v85_v7, %v82_v6 }
  0x25   :  { %532 = vmatprep.subr.bf16.mxu0 %v531_v42  ;;  %564 = vmatprep.subr.bf16.mxu1 %v563_v45  ;;  %v545_v14 = vpack.c.bf16 %v83_v12, %v80_v11  ;;  %v37_v15 = vld [vmem:[%s859_s1 + $0x8] sm:$0xff] }
  0x26   :  { %265 = vperm.xlu0 %585, %v251_v62   ;;  %v390_v44 = vld [vmem:[%s860_s2 + $0x8] sm:$0xff] }
  0x28   :  { %534 = vmatpush1.bf16.msra.mxu0 %v533_v50  ;;  %566 = vmatpush3.bf16.msra.mxu1 %v563_v45 }
  0x29   :  { %536 = vmatprep.subr.bf16.mxu0 %v535_v53  ;;  %568 = vmatprep.subr.bf16.mxu1 %v567_v56 }
  0x2a   :  { %405 = vperm.xlu0 %585, %v389_v9  }
  0x2c   :  { %538 = vmatpush1.bf16.msra.mxu0 %v537_v61  ;;  %570 = vmatpush3.bf16.msra.mxu1 %v567_v56 }
  0x2d   :  { %540 = vmatprep.subr.bf16.mxu0 %v539_v63  ;;  %572 = vmatprep.subr.bf16.mxu1 %v571_v3 }
  0x30   :  { %542 = vmatpush1.bf16.msra.mxu0 %v541_v8  ;;  %574 = vmatpush3.bf16.msra.mxu1 %v571_v3 }
  0x31   :  { %544 = vmatprep.subr.bf16.mxu0 %v543_v10  ;;  %576 = vmatprep.subr.bf16.mxu1 %v575_v13 }
  0x34   :  { %546 = vmatpush1.bf16.msra.mxu0 %v545_v14  ;;  %578 = vmatpush3.bf16.msra.mxu1 %v575_v13 }
  0x37   :  { %151 = vmatmul.mubr.f32.vlgmr.msra.gmra.mrb[0].mxu0 %v36_v51  ;;  %513 = vmatmul.mubr.f32.vlgmr.msra.gmra.mrb[0].mxu1 %v37_v15 }
  0x38   :  { %156 = vmatprep.mubr.f32.mxu0 %v638_v0 }
  0x3b   :  { %157 = vmatmul.mubr.f32.gmra.mrb[2].mxu0 %v37_v15 }
  0xa1   :  { %v708_v19 = vpop.permute.xlu0 %262 }
  0xa2   :  { %vm267_vm0 = vcmp.eq.s32.totalorder %v703_v17, %v708_v19  ;;  %vm268_vm1 = vcmp.eq.s32.totalorder %v706_v18, %v708_v19  ;;  %vm269_vm2 = vcmp.eq.s32.totalorder %v711_v20, %v708_v19 }
  0xa5   :  { %v742_v31 = vpop.permute.xlu0 %265 }
  0xa6   :  { %vm270_vm3 = vcmp.eq.s32.totalorder %v703_v17, %v742_v31  ;;  %vm271_vm4 = vcmp.eq.s32.totalorder %v706_v18, %v742_v31  ;;  %vm272_vm5 = vcmp.eq.s32.totalorder %v711_v20, %v742_v31 }
  0xa7   :  { %v451_v19 = vsel %vm270_vm3, 1.0, %v638_v0 }
 0x10a   :  { %v713_v21 = vpop.f32.mrb[0].mxu0  ;;  %v718_v23 = vpop.f32.mrb[0].mxu1 }
 0x10b   :  { %v442_v22 = vclamps-f32 %v713_v21, 1.0  ;;  %v720_v24 = vpop.f32.mrb[1].mxu0  ;;  %v725_v26 = vpop.f32.mrb[1].mxu1  ;;  %v447_v35 = vclamps-f32 %v718_v23, 1.0  ;;  %v453_v21 = vsel %vm272_vm5, 1.0, %v638_v0 }
 0x10c   :  { %v443_v25 = vclamps-f32 %v720_v24, 1.0  ;;  %v444_v28 = vclamps-f32 %v725_v26, 1.0 }
 0x10d   :  { %v285_v27 = vsel %vm267_vm0, %v442_v22, 0.0  ;;  %v290_v42 = vsel %vm272_vm5, %v447_v35, 0.0 }
 0x10e   :  { %v286_v29 = vsel %vm268_vm1, %v443_v25, 0.0  ;;  %v740_v30 = vpop.f32.mrb[2].mxu0  ;;  %v287_v37 = vsel %vm269_vm2, %v444_v28, 0.0 }
 0x10f   :  { %v445_v32 = vclamps-f32 %v740_v30, 1.0  ;;  %v745_v33 = vpop.f32.mrb[3].mxu0  ;;  %v291_v34 = vadd.f32 %v286_v29, %v285_v27 }
 0x110   :  { %v446_v36 = vclamps-f32 %v745_v33, 1.0 }
 0x111   :  { %v288_v38 = vsel %vm270_vm3, %v445_v32, 0.0  ;;  %v292_v39 = vadd.f32 %v291_v34, %v287_v37 }
 0x112   :  { %v289_v40 = vsel %vm271_vm4, %v446_v36, 0.0 }
 0x113   :  { %v295_v41 = vadd.f32 %v289_v40, %v288_v38  ;;  %293 = vadd.xlane.f32.xlu1 %v292_v39 }
 0x115   :  { %v296_v43 = vadd.f32 %v295_v41, %v290_v42 }
 0x117   :  { %297 = vadd.xlane.f32.xlu1 %v296_v43 }
 0x128   :  { %410 = vperm.xlu1 %586, %v390_v44  }
 0x1a0   :  { %v778_v45 = vpop.xlane.xlu1 %293 }
 0x1a1   :  { %vm309_vm6 = vcmp.le.f32.partialorder %v778_v45, 0.70710677  ;;  %vm317_vm7 = vcmp.le.f32.partialorder %v778_v45, 1.7948966e-09  ;;  %vm325_vm8 = vcmp.le.f32.partialorder %v778_v45, -0.70710677  ;;  %v299_v62 = vmul.f32 %v778_v45, %v778_v45 }
 0x1a2   :  { %v454_v46 = vsel %vm309_vm6, 1.0, %v638_v0  ;;  %v456_v47 = vsel %vm317_vm7, 1.0, %v638_v0  ;;  %vm333_vm9 = vcmp.le.f32.partialorder %v778_v45, -1.0  ;;  %v458_v49 = vsel %vm325_vm8, 1.0, %v638_v0 }
 0x1a3   :  { %v323_v48 = vadd.f32 %v456_v47, %v454_v46  ;;  %v460_v52 = vsel %vm333_vm9, 1.0, %v638_v0  ;;  %v301_v4 = vmul.f32 8.0, %v299_v62 }
 0x1a4   :  { %v787_v50 = vpop.xlane.xlu1 %297 }
 0x1a5   :  { %v331_v51 = vadd.f32 %v458_v49, %v323_v48  ;;  %vm310_vm10 = vcmp.le.f32.partialorder %v787_v50, 0.70710677  ;;  %vm318_vm11 = vcmp.le.f32.partialorder %v787_v50, 1.7948966e-09  ;;  %vm326_vm12 = vcmp.le.f32.partialorder %v787_v50, -0.70710677 }
 0x1a6   :  { %v455_v53 = vsel %vm310_vm10, 1.0, %v638_v0  ;;  %v457_v55 = vsel %vm318_vm11, 1.0, %v638_v0  ;;  %vm334_vm13 = vcmp.le.f32.partialorder %v787_v50, -1.0  ;;  %v459_v58 = vsel %vm326_vm12, 1.0, %v638_v0 }
 0x1a7   :  { %v339_v54 = vadd.f32 %v460_v52, %v331_v51  ;;  %v324_v56 = vadd.f32 %v457_v55, %v455_v53  ;;  %v461_v61 = vsel %vm334_vm13, 1.0, %v638_v0  ;;  %v300_v8 = vmul.f32 %v787_v50, %v787_v50 }
 0x1a8   :  { %v303_v9 = vmul.f32 %v301_v4, %v299_v62  ;;  %v448_v62 = vsel %vm267_vm0, 1.0, %v638_v0 }
 0x1a9   :  { %v341_v57 = vand.u32 2147483647, %v339_v54  ;;  %v332_v59 = vadd.f32 %v459_v58, %v324_v56  ;;  %v350_v13 = vand.u32 2147483648, %v339_v54  ;;  %v302_v16 = vmul.f32 8.0, %v300_v8 }
 0x1aa   :  { %v305_v27 = vsub.f32 %v303_v9, %v301_v4  ;;  %v379_v49 = vmul.f32 2.0, %v339_v54  ;;  %v449_v54 = vsel %vm268_vm1, 1.0, %v638_v0 }
 0x1ab   :  { %v343_v60 = vmul.f32 0.5, %v341_v57  ;;  %v340_v63 = vadd.f32 %v461_v61, %v332_v59  ;;  %v304_v40 = vmul.f32 %v302_v16, %v300_v8  ;;  %v406_v8 = vpop.permute.xlu0 %405 }
 0x1ac   :  { %v307_v43 = vadd.f32 1.0, %v305_v27 }
 0x1ad   :  { %v344_v1 = vfloor.f32 %v343_v60  ;;  %v352_v2 = vand.u32 2147483647, %v340_v63  ;;  %v361_v38 = vand.u32 2147483648, %v340_v63  ;;  %v306_v47 = vsub.f32 %v304_v40, %v302_v16 }
 0x1ae   :  { %v380_v60 = vmul.f32 2.0, %v340_v63 }
 0x1af   :  { %v345_v3 = vmul.f32 2.0, %v344_v1  ;;  %v354_v5 = vmul.f32 0.5, %v352_v2  ;;  %v308_v55 = vadd.f32 1.0, %v306_v47  ;;  %v450_v1 = vsel %vm269_vm2, 1.0, %v638_v0 }
 0x1b1   :  { %v346_v6 = vsub.f32 %v341_v57, %v345_v3  ;;  %v355_v7 = vfloor.f32 %v354_v5  ;;  %v386_v57 = vstv %s858_s0  ;;  %s640_s0 = smov [#allocation6]  }
 0x1b2   :  { %s430_s17 = sshll.u32 %s640_s0, 4  ;;  %s431_s17 = int_to_ptr.vmem [resolvable:$true] %s430_s17 }
 0x1b3   :  { %vm347_vm14 = vcmp.eq.f32.partialorder %v346_v6, 2.0  ;;  %v356_v11 = vmul.f32 2.0, %v355_v7  ;;  %s609_s18 = scalar_lea.vmem %s431_s17, 768  ;;  %p614_p9 = scmp.lt.s32.totalorder %s431_s17, %s431_s17 }
 0x1b4   :  { %v348_v10 = vsel %vm347_vm14, 0.0, %v346_v6  ;;  %p610_p8 = scmp.ne.s32.totalorder %s431_s17, %s609_s18  ;;  %p615_p10 = scmp.lt.s32.totalorder %s609_s18, %s609_s18 }
 0x1b5   :  { %v349_v12 = vand.u32 2147483647, %v348_v10  ;;  %v357_v14 = vsub.f32 %v352_v2, %v356_v11  ;;  %v411_v11 = vpop.permute.xlu1 %410 }
 0x1b6   :  { %p616_p11 = por %p615_p10, %p614_p9 }
 0x1b7   :  { %v351_v15 = vor.u32 %v350_v13, %v349_v12  ;;  %vm358_vm15 = vcmp.eq.f32.partialorder %v357_v14, 2.0 }
 0x1b8   :  { %v359_v34 = vsel %vm358_vm15, 0.0, %v357_v14  ;;  %p617_p12 = pnand %p616_p11, %p610_p8 }
 0x1b9   :  { %vm363_vm6 = vcmp.ne.f32.partialorder %v351_v15, 0.0  ;;  %vm365_vm7 = vcmp.lt.f32.partialorder %v351_v15, 0.0  ;;  %v369_v29 = vadd.f32 2.0, %v351_v15  ;;  %v360_v37 = vand.u32 2147483647, %v359_v34 }
 0x1ba   :  { %vm367_vm8 = vmand %vm365_vm7, %vm363_vm6 }
 0x1bb   :  { %v371_v39 = vsel %vm367_vm8, %v369_v29, %v351_v15  ;;  %v362_v42 = vor.u32 %v361_v38, %v360_v37 }
 0x1bc   :  { %v373_v41 = vmul.f32 2.0, %v371_v39 }
 0x1bd   :  { %vm364_vm9 = vcmp.ne.f32.partialorder %v362_v42, 0.0  ;;  %vm366_vm10 = vcmp.lt.f32.partialorder %v362_v42, 0.0  ;;  %v370_v46 = vadd.f32 2.0, %v362_v42 }
 0x1be   :  { %v375_v44 = vsub.f32 1.0, %v373_v41  ;;  %vm368_vm11 = vmand %vm366_vm10, %vm364_vm9 }
 0x1bf   :  { %v372_v51 = vsel %vm368_vm11, %v370_v46, %v362_v42 }
 0x1c0   :  { %v377_v48 = vmul.f32 %v375_v44, %v307_v43  ;;  %v374_v52 = vmul.f32 2.0, %v372_v51 }
 0x1c2   :  { %v381_v53 = vsub.f32 %v377_v48, %v379_v49  ;;  %v376_v56 = vsub.f32 1.0, %v374_v52 }
 0x1c4   :  { %v384_v58 = vsub.f32 %v381_v53, %v778_v45  ;;  %v378_v59 = vmul.f32 %v376_v56, %v308_v55 }
 0x1c6   :  { %v387_v61 = vmul.f32 %v386_v57, %v384_v58  ;;  %v382_v2 = vsub.f32 %v378_v59, %v380_v60 }
 0x1c8   :  { %v391_v45 = vmul.f32 %v448_v62, %v387_v61  ;;  %v392_v3 = vmul.f32 %v449_v54, %v387_v61  ;;  %v393_v63 = vmul.f32 %v450_v1, %v387_v61  ;;  %v385_v4 = vsub.f32 %v382_v2, %v787_v50 }
 0x1c9   :  { %v452_v50 = vsel %vm271_vm4, 1.0, %v638_v0 }
 0x1ca   :  { %v397_v5 = vadd.f32 %v442_v22, %v391_v45  ;;  %v398_v6 = vadd.f32 %v443_v25, %v392_v3  ;;  %v399_v7 = vadd.f32 %v444_v28, %v393_v63  ;;  %v388_v9 = vmul.f32 %v386_v57, %v385_v4 }
 0x1cc   :  { %v413_v22 = vmul.f32 %v406_v8, %v397_v5  ;;  %v414_v24 = vmul.f32 %v406_v8, %v398_v6  ;;  %v415_v25 = vmul.f32 %v406_v8, %v399_v7  ;;  %v394_v26 = vmul.f32 %v451_v19, %v388_v9 }
 0x1cd   :  { %v395_v28 = vmul.f32 %v452_v50, %v388_v9  ;;  %v396_v10 = vmul.f32 %v453_v21, %v388_v9 }
 0x1ce   :  { %419 = vst [vmem:[#allocation6] sm:$0xff] %v413_v22  ;;  %420 = vst [vmem:[#allocation6 + $0x8] sm:$0xff] %v414_v24  ;;  %v400_v17 = vadd.f32 %v445_v32, %v394_v26 }
 0x1cf   :  { %421 = vst [vmem:[#allocation6 + $0x10] sm:$0xff] %v415_v25  ;;  %v401_v18 = vadd.f32 %v446_v36, %v395_v28  ;;  %v402_v0 = vadd.f32 %v447_v35, %v396_v10 }
 0x1d0   :  { %v416_v20 = vmul.f32 %v411_v11, %v400_v17 }
 0x1d1   :  { %v417_v31 = vmul.f32 %v411_v11, %v401_v18  ;;  %v418_v12 = vmul.f32 %v411_v11, %v402_v0 }
 0x1d2   :  { %422 = vst [vmem:[#allocation6 + $0x18] sm:$0xff] %v416_v20 }
 0x1d3   :  { %423 = vst [vmem:[#allocation6 + $0x20] sm:$0xff] %v417_v31  ;;  %424 = vst [vmem:[#allocation6 + $0x28] sm:$0xff] %v418_v12 }
 0x1d4   :  { %620 = shalt.err (!%p617_p12)
}
 0x1d5   :  { %s621_s21 = scalar_lea.hbm %s863_s5, 768 }
 0x1d6   :  { %p622_p13 = scmp.ne.s32.totalorder %s863_s5, %s621_s21  ;;  %p625_p0 = scmp.lt.u32.totalorder %s621_s21, %s863_s5 }
 0x1d8   :  { %p627_p1 = pnand %p625_p0, %p622_p13 }
 0x1da   :  { %630 = shalt.err (!%p627_p1)
}
 0x1db   :  { %436 = dma.vmem_to_hbm [thread:$0]  %s431_s17, 768, %s863_s5, [#allocation5], %s636_s28, %s636_s28, %s637_s29  }
 0x1dc   :  { %633 = dma.done.wait [#allocation5], 768  }
 0x1dd   :  { %634 = vsyncadd [#allocation5], 4294966528 }
 0x1de   :  { %440 = vsyncpa [#allocation4], 1 }
 0x1df   :  { %441 = vsyncpa [#allocation5], 1 }

</bundles_post_ra>
